<compile_context>
chip_gen: v7x
topology: tpu7x:2x2x1
jax: 0.10.0
libtpu: 0.0.40
codegen_flags: <defaults>
</compile_context>

<pallas_src>
import functools

import jax
import jax.numpy as jnp
from jax.experimental import pallas as pl
from jax.experimental.pallas import tpu as pltpu

_MiB = 1024 * 1024


# --------------------------------------------------------------------------- #
# helpers
# --------------------------------------------------------------------------- #
def _round_up(x, m):
    return ((x + m - 1) // m) * m


def _apply_activation(y, act):
    """Static (trace-time) activation selection. None == LinearActivation."""
    if act is None or act == "linear":
        return y
    if act == "relu":
        return jnp.maximum(y, 0.0)
    if act == "tanh":
        return jnp.tanh(y)
    if act == "sigmoid":
        return jax.nn.sigmoid(y)
    raise ValueError(f"unsupported activation: {act!r}")


def _tpu_vmem_capacity_bytes():
    try:
        info = pltpu.get_tpu_info()
        return int(getattr(info, "vmem_capacity_bytes", 64 * _MiB))
    except Exception:
        return 64 * _MiB  # conservative default (v7x per-TC physical VMEM)


def _vmem_limit_bytes():
    cap = _tpu_vmem_capacity_bytes()
    # 128 MiB parts (v5e/v6e) -> 64 MiB scoped limit; 64 MiB parts (v7x) -> 32 MiB.
    return int(min(max(cap // 2, 32 * _MiB), 64 * _MiB))


def _tile_candidates():
    cap = _tpu_vmem_capacity_bytes()
    if cap >= 96 * _MiB:                 # v5e / v6e (128 MiB VMEM)
        return (1024, 512, 256, 128)
    return (512, 256, 128)               # v7x (64 MiB VMEM)


def _largest_divisor_tile(dim, candidates):
    for c in candidates:
        if dim % c == 0:
            return c
    return dim


def _largest_mult_divisor(n, cap, sub):
    """Largest d with d | n, d % sub == 0, d <= cap (n must be a multiple of sub)."""
    best = sub
    q = n // sub
    i = 1
    while i * i <= q:
        if q % i == 0:
            for d in (i, q // i):
                t = sub * d
                if best < t <= cap:
                    best = t
        i += 1
    return best


def _pad_batch(M, sub):
    """Pad batch to the sublane granularity only; fall back to multiple-of-128
    padding when the sub-padded size has no reasonable batch-tile divisor."""
    Mp = _round_up(M, sub)
    if Mp <= 512 or _largest_mult_divisor(Mp, 512, sub) >= 64:
        return Mp
    return _round_up(M, 128)


def _fused_batch_tile(Bp, F, itemsize, budget, row_cap, sub):
    """Largest legal batch tile for the fused kernel, or None if it can't fit.

    VMEM model: x double-buffered + output double-buffered (both (tb,F)) plus a
    double-buffered (F,F) layer weight.
    """
    avail = budget - itemsize * 2 * F * F
    if avail <= 0:
        return None
    tb_max = avail // (itemsize * 4 * F)
    if tb_max < sub:
        return None
    cap = max(sub, min(int(row_cap), int(tb_max)))
    if Bp <= cap:
        return Bp
    return _largest_mult_divisor(Bp, cap, sub)


# --------------------------------------------------------------------------- #
# fused whole-MLP kernel: activation accumulates directly in the resident
# output block (block index constant along the layer axis), batch-tiled grid.
# --------------------------------------------------------------------------- #
def _fused_mlp_kernel(x_ref, w_ref, o_ref, *,
                      n_layers, hidden_activation, output_activation):
    l = pl.program_id(1)          # layer axis (inner, "arbitrary")

    @pl.when(l == 0)
    def _():
        o_ref[...] = x_ref[...].astype(o_ref.dtype)

    y = jnp.dot(o_ref[...], w_ref[0], preferred_element_type=jnp.float32)

    if n_layers == 1:
        o_ref[...] = _apply_activation(y, output_activation).astype(o_ref.dtype)
    elif hidden_activation == output_activation:
        o_ref[...] = _apply_activation(y, hidden_activation).astype(o_ref.dtype)
    else:
        is_last = l == n_layers - 1

        @pl.when(jnp.logical_not(is_last))
        def _():
            o_ref[...] = _apply_activation(y, hidden_activation).astype(o_ref.dtype)

        @pl.when(is_last)
        def _():
            o_ref[...] = _apply_activation(y, output_activation).astype(o_ref.dtype)


def pallas_mlp_fused(x_pad, w_stack, *, tb, hidden_activation, output_activation,
                     vmem_limit):
    """x_pad: (Bp, F), w_stack: (L, F, F) (pre-transposed, zero-padded)."""
    Bp, F = x_pad.shape
    L = w_stack.shape[0]
    n_btiles = Bp // tb
    dsz = jnp.dtype(x_pad.dtype).itemsize
    wsz = jnp.dtype(w_stack.dtype).itemsize

    kernel = functools.partial(
        _fused_mlp_kernel,
        n_layers=L,
        hidden_activation=hidden_activation,
        output_activation=output_activation,
    )
    has_transc = any(a in ("tanh", "sigmoid")
                     for a in (hidden_activation, output_activation))
    cost_est = pl.CostEstimate(
        flops=2 * Bp * F * F * L,
        transcendentals=Bp * F * L if has_transc else 0,
        bytes_accessed=dsz * 2 * Bp * F + wsz * n_btiles * L * F * F,
    )
    return pl.pallas_call(
        kernel,
        out_shape=jax.ShapeDtypeStruct((Bp, F), x_pad.dtype),
        grid_spec=pltpu.PrefetchScalarGridSpec(
            num_scalar_prefetch=0,
            grid=(n_btiles, L),
            in_specs=[
                pl.BlockSpec((tb, F), lambda b, l: (b, 0)),       # activation src (read at l==0)
                pl.BlockSpec((1, F, F), lambda b, l: (l, 0, 0)),  # per-layer weight (pipelined)
            ],
            out_specs=pl.BlockSpec((tb, F), lambda b, l: (b, 0)), # resident accumulator
        ),
        compiler_params=pltpu.CompilerParams(
            dimension_semantics=("parallel", "arbitrary"),
            vmem_limit_bytes=vmem_limit,
        ),
        cost_estimate=cost_est,
    )(x_pad, w_stack)


# --------------------------------------------------------------------------- #
# tiled per-layer linear kernels (fallback for large / uneven widths)
# --------------------------------------------------------------------------- #
def _linear_kernel_noacc(x_ref, w_ref, o_ref, *, activation):
    y = jnp.dot(x_ref[...], w_ref[...], preferred_element_type=jnp.float32)
    o_ref[...] = _apply_activation(y, activation).astype(o_ref.dtype)


def _linear_kernel_acc(x_ref, w_ref, o_ref, acc_ref, *, activation):
    k = pl.program_id(2)

    @pl.when(k == 0)
    def _():
        acc_ref[...] = jnp.zeros_like(acc_ref)

    acc_ref[...] += jnp.dot(x_ref[...], w_ref[...],
                            preferred_element_type=jnp.float32)

    @pl.when(k == pl.num_programs(2) - 1)
    def _():
        o_ref[...] = _apply_activation(acc_ref[...], activation).astype(o_ref.dtype)


def pallas_linear(x, w_t, activation=None, *, vmem_limit, tile_budget,
                  tile_candidates):
    """y = activation(x @ w_t). x: (Mp, Kp), w_t: (Kp, Np).

    Mp is a multiple of the sublane granularity; Kp, Np are multiples of 128
    (padded by the caller) -> all tiles are lane/sublane dense.
    """
    Mp, Kp = x.shape
    Kp2, Np = w_t.shape
    assert Kp == Kp2
    dsz = jnp.dtype(x.dtype).itemsize
    sub = 8 if dsz >= 4 else 16

    tm = _largest_mult_divisor(Mp, 512, sub)          # divides Mp, multiple of sub
    tn = _largest_divisor_tile(Np, tile_candidates)
    single_k_cap = 2 * tile_candidates[0]
    single_k = Kp <= single_k_cap
    tk = Kp if single_k else _largest_divisor_tile(Kp, tile_candidates)

    def _cost(tm_, tn_, tk_):
        # double-buffered inputs + double-buffered output (+ f32 accumulator)
        b = dsz * (2 * tm_ * tk_ + 2 * tk_ * tn_ + 2 * tm_ * tn_)
        if not single_k:
            b += 4 * tm_ * tn_
        return b

    while _cost(tm, tn, tk) > tile_budget:
        if not single_k and tk > 128:
            tk //= 2
        elif tn > 128:
            tn //= 2
        elif tm > sub and tm % (2 * sub) == 0:       # halving stays legal: tm/2 | Mp
            tm //= 2
        else:
            break

    m_tiles, n_tiles, k_tiles = Mp // tm, Np // tn, Kp // tk

    cost_est = pl.CostEstimate(
        flops=2 * Mp * Np * Kp,
        transcendentals=Mp * Np if activation in ("tanh", "sigmoid") else 0,
        bytes_accessed=dsz * (Mp * Kp + Kp * Np + Mp * Np),
    )

    if single_k:
        kernel = functools.partial(_linear_kernel_noacc, activation=activation)
        # Choose loop order so the LARGER operand keeps a constant block index
        # on the inner axis (fetched once) instead of being re-streamed per
        # outer tile.
        traffic_ij = m_tiles * Kp * Np + Mp * Kp      # i outer: weight re-streamed
        traffic_ji = n_tiles * Mp * Kp + Kp * Np      # j outer: x re-streamed
        if traffic_ji < traffic_ij:
            grid = (n_tiles, m_tiles)
            a_spec = pl.BlockSpec((tm, Kp), lambda j, i: (i, 0))
            b_spec = pl.BlockSpec((Kp, tn), lambda j, i: (0, j))
            o_spec = pl.BlockSpec((tm, tn), lambda j, i: (i, j))
        else:
            grid = (m_tiles, n_tiles)
            a_spec = pl.BlockSpec((tm, Kp), lambda i, j: (i, 0))
            b_spec = pl.BlockSpec((Kp, tn), lambda i, j: (0, j))
            o_spec = pl.BlockSpec((tm, tn), lambda i, j: (i, j))
        return pl.pallas_call(
            kernel,
            out_shape=jax.ShapeDtypeStruct((Mp, Np), x.dtype),
            grid_spec=pltpu.PrefetchScalarGridSpec(
                num_scalar_prefetch=0,
                grid=grid,
                in_specs=[a_spec, b_spec],
                out_specs=o_spec,
            ),
            compiler_params=pltpu.CompilerParams(
                dimension_semantics=("parallel", "parallel"),
                vmem_limit_bytes=vmem_limit,
            ),
            cost_estimate=cost_est,
        )(x, w_t)

    kernel = functools.partial(_linear_kernel_acc, activation=activation)
    return pl.pallas_call(
        kernel,
        out_shape=jax.ShapeDtypeStruct((Mp, Np), x.dtype),
        grid_spec=pltpu.PrefetchScalarGridSpec(
            num_scalar_prefetch=0,
            grid=(m_tiles, n_tiles, k_tiles),
            in_specs=[
                pl.BlockSpec((tm, tk), lambda i, j, k: (i, k)),
                pl.BlockSpec((tk, tn), lambda i, j, k: (k, j)),
            ],
            out_specs=pl.BlockSpec((tm, tn), lambda i, j, k: (i, j)),
            scratch_shapes=[pltpu.VMEM((tm, tn), jnp.float32)],
        ),
        compiler_params=pltpu.CompilerParams(
            dimension_semantics=("parallel", "parallel", "arbitrary"),
            vmem_limit_bytes=vmem_limit,
        ),
        cost_estimate=cost_est,
    )(x, w_t)


# --------------------------------------------------------------------------- #
# MLP wrapper mirroring the PyTorch module
# --------------------------------------------------------------------------- #
class MLPPallas:
    """Bias-free Linear chain, matching dynamic_brainage MLP layer construction."""

    def __init__(self, m_in=128, m_out=128, h=None,
                 hidden_activation=None,    # None == LinearActivation
                 output_activation=None,    # None == LinearActivation
                 flatten=False, unflatten=False, key=None,
                 use_fused=None,            # None=auto, True=force, False=never
                 compute_dtype=jnp.float32, # opt-in jnp.bfloat16 (f32 accumulate)
                 fused_row_cap=1024):
        h = list(h) if h is not None else []
        h = h + [m_out]
        self.m_in = m_in
        self.m_out = m_out
        self.flatten = flatten
        self.unflatten = unflatten
        self.hidden_activation = hidden_activation
        self.output_activation = output_activation
        self._compute_dtype = jnp.dtype(compute_dtype)
        self._sub = 8 if self._compute_dtype.itemsize >= 4 else 16
        self._fused_row_cap = fused_row_cap

        if key is None:
            key = jax.random.PRNGKey(0)

        # PyTorch-layout weights (out_features, in_features), nn.Linear init range.
        dims = [m_in] + h
        self.weights = []
        for i in range(len(h)):
            fan_in, fan_out = dims[i], dims[i + 1]
            key, sub = jax.random.split(key)
            bound = 1.0 / (fan_in ** 0.5)
            self.weights.append(jax.random.uniform(
                sub, (fan_out, fan_in), jnp.float32, minval=-bound, maxval=bound))

        n_layers = len(self.weights)
        self._acts = [self.output_activation if i == n_layers - 1
                      else self.hidden_activation for i in range(n_layers)]

        self._vmem_limit = _vmem_limit_bytes()
        # _cost()/_fused_batch_tile already count double-buffering, so only keep
        # a modest safety margin (review: the previous //2 was double-conservative).
        self._tile_budget = int(0.85 * self._vmem_limit)
        self._tile_candidates = _tile_candidates()

        cdt = self._compute_dtype
        # Pre-transpose + lane-pad weights ONCE (cached; no per-forward transpose).
        self._dims = dims
        self._pdims = [_round_up(d, 128) for d in dims]
        self._w_t_pad = []
        for i, w in enumerate(self.weights):
            kp, np_ = self._pdims[i], self._pdims[i + 1]
            wt = jnp.pad(jnp.transpose(w),
                         ((0, kp - w.shape[1]), (0, np_ - w.shape[0])))
            self._w_t_pad.append(wt.astype(cdt))

        # Fused-path weight stack at a common padded width F, only when the
        # FxF padding overhead is modest and a double-buffered (F,F) weight
        # block fits the VMEM budget.
        self._fmax = max(self._pdims)
        self._use_fused = use_fused
        self._w_stack = None
        F = self._fmax
        actual_w = sum(self._pdims[i] * self._pdims[i + 1] for i in range(n_layers))
        padded_w = n_layers * F * F
        pad_ok = padded_w <= 1.5 * actual_w
        fits = 2 * F * F * cdt.itemsize <= self._tile_budget
        if use_fused is True or (use_fused is None and pad_ok and fits):
            slabs = [jnp.pad(jnp.transpose(w),
                             ((0, F - w.shape[1]), (0, F - w.shape[0]))).astype(cdt)
                     for w in self.weights]
            self._w_stack = jnp.stack(slabs, axis=0)   # (L, F, F)

        self._jit_forward = jax.jit(self._forward)

    # ------------------------------------------------------------------ #
    def _forward(self, x):
        S = x.shape
        if self.flatten:
            x = x.reshape(S[0], -1)
        lead = x.shape[:-1]
        x2 = x.reshape(-1, x.shape[-1]).astype(self._compute_dtype)
        M, F_in = x2.shape
        assert F_in == self.m_in, f"expected last dim {self.m_in}, got {F_in}"

        Mp = _pad_batch(M, self._sub)
        dsz = self._compute_dtype.itemsize

        out = None
        if self._w_stack is not None:
            F = self._fmax
            tb = _fused_batch_tile(Mp, F, dsz, self._tile_budget,
                                   self._fused_row_cap, self._sub)
            if tb is not None:
                x_pad = jnp.pad(x2, ((0, Mp - M), (0, F - F_in)))
                y = pallas_mlp_fused(
                    x_pad, self._w_stack, tb=tb,
                    hidden_activation=self.hidden_activation,
                    output_activation=self.output_activation,
                    vmem_limit=self._vmem_limit)
                out = y[:M, :self.m_out]

        if out is None:
            xp = jnp.pad(x2, ((0, Mp - M), (0, self._pdims[0] - F_in)))
            for wt, act in zip(self._w_t_pad, self._acts):
                xp = pallas_linear(xp, wt, activation=act,
                                   vmem_limit=self._vmem_limit,
                                   tile_budget=self._tile_budget,
                                   tile_candidates=self._tile_candidates)
            out = xp[:M, :self.m_out]

        out = out.astype(jnp.float32).reshape(*lead, self.m_out)
        if self.unflatten:
            out = out.reshape(*S)
        return out

    def __call__(self, x):
        return self._jit_forward(x)

    # ------------------------------------------------------------------ #
    def reference(self, x):
        """Pure-jnp f32 reference for correctness checking."""
        S = x.shape
        if self.flatten:
            x = x.reshape(S[0], -1)
        lead = x.shape[:-1]
        h = x.reshape(-1, x.shape[-1]).astype(jnp.float32)
        for w, act in zip(self.weights, self._acts):
            h = _apply_activation(h @ w.T, act)
        out = h.reshape(*lead, self.m_out)
        if self.unflatten:
            out = out.reshape(*S)
        return out


# --------------------------------------------------------------------------- #
if __name__ == "__main__":
    key = jax.random.PRNGKey(0)
    k1, k2, k3, k4, k5, kw1, kw2, kw3, kw4, kw5 = jax.random.split(key, 10)

    # 1) Fused whole-MLP path: hidden layer + ReLU.
    x1 = jax.random.normal(k1, (8, 128), dtype=jnp.float32)
    mlp1 = MLPPallas(m_in=128, m_out=128, h=[64],
                     hidden_activation="relu", output_activation=None, key=kw1)
    o1 = jax.block_until_ready(mlp1(x1))
    r1 = mlp1.reference(x1)
    assert o1.shape == (8, 128)
    assert jnp.allclose(o1, r1, atol=1e-3, rtol=1e-3), "fused path mismatch"

    # 2) Tiled per-layer path (forced), non-128-multiple widths + tanh/relu
    #    (exercises lane padding, padded-batch handling, grid-order selection).
    x2 = jax.random.normal(k2, (12, 100), dtype=jnp.float32)
    mlp2 = MLPPallas(m_in=100, m_out=50, h=[70],
                     hidden_activation="tanh", output_activation="relu",
                     key=kw2, use_fused=False)
    o2 = jax.block_until_ready(mlp2(x2))
    r2 = mlp2.reference(x2)
    assert o2.shape == (12, 50)
    assert jnp.allclose(o2, r2, atol=1e-3, rtol=1e-3), "tiled path mismatch"

    # 3) flatten / unflatten glue + output activation, single linear.
    x3 = jax.random.normal(k3, (2, 4, 16), dtype=jnp.float32)
    mlp3 = MLPPallas(m_in=64, m_out=64, h=[],
                     hidden_activation=None, output_activation="tanh",
                     flatten=True, unflatten=True, key=kw3)
    o3 = jax.block_until_ready(mlp3(x3))
    r3 = mlp3.reference(x3)
    assert o3.shape == (2, 4, 16)
    assert jnp.allclose(o3, r3, atol=1e-3, rtol=1e-3), "flatten path mismatch"

    # 4) Fused path with MULTIPLE batch tiles (small fused_row_cap forces tb=8,
    #    grid=(3, 3)) and distinct hidden/output activations (sigmoid/relu),
    #    batch not a multiple of 8 (exercises sublane padding).
    x4 = jax.random.normal(k4, (20, 128), dtype=jnp.float32)
    mlp4 = MLPPallas(m_in=128, m_out=128, h=[32, 64],
                     hidden_activation="sigmoid", output_activation="relu",
                     key=kw4, fused_row_cap=8)
    o4 = jax.block_until_ready(mlp4(x4))
    r4 = mlp4.reference(x4)
    assert o4.shape == (20, 128)
    assert jnp.allclose(o4, r4, atol=1e-3, rtol=1e-3), "batch-tiled fused mismatch"

    # 5) Opt-in bf16 compute path (f32 accumulation), looser tolerance.
    x5 = jax.random.normal(k5, (16, 128), dtype=jnp.float32)
    mlp5 = MLPPallas(m_in=128, m_out=128, h=[128],
                     hidden_activation="relu", output_activation=None,
                     key=kw5, compute_dtype=jnp.bfloat16)
    o5 = jax.block_until_ready(mlp5(x5))
    r5 = mlp5.reference(x5)
    assert o5.shape == (16, 128)
    assert jnp.allclose(o5, r5, atol=1e-1, rtol=1e-1), "bf16 path mismatch"

    print("KERNEL_OK")
</pallas_src>

<mosaic_0001>
module attributes {stable_mosaic.version = 11 : i64} {
  func.func @_fused_mlp_kernel(%arg0: i32, %arg1: i32, %arg2: memref<8x128xf32, #tpu.memory_space<vmem>>, %arg3: memref<1x128x128xf32, #tpu.memory_space<vmem>>, %arg4: memref<8x128xf32, #tpu.memory_space<vmem>>) attributes {dimension_semantics = [#tpu.dimension_semantics<parallel>, #tpu.dimension_semantics<arbitrary>], iteration_bounds = array<i64: 1, 2>, scalar_prefetch = 0 : i64, scratch_operands = 0 : i64, tpu.core_type = #tpu.core_type<tc>, window_params = [{transform_indices = @transform_0, window_bounds = array<i64: 8, 128>}, {transform_indices = @transform_1, window_bounds = array<i64: 1, 128, 128>}, {transform_indices = @transform_2, window_bounds = array<i64: 8, 128>}]} {
    %c0_i32 = arith.constant 0 : i32
    %0 = arith.cmpi eq, %arg1, %c0_i32 : i32
    %1 = arith.extui %0 : i1 to i32
    %c0_i32_0 = arith.constant 0 : i32
    %2 = arith.cmpi ne, %1, %c0_i32_0 : i32
    scf.if %2 {
      %c0_7 = arith.constant 0 : index
      %c0_8 = arith.constant 0 : index
      %13 = vector.load %arg2[%c0_7, %c0_8] : memref<8x128xf32, #tpu.memory_space<vmem>>, vector<8x128xf32>
      %c0_9 = arith.constant 0 : index
      %c0_10 = arith.constant 0 : index
      %14 = vector.load %arg4[%c0_9, %c0_10] : memref<8x128xf32, #tpu.memory_space<vmem>>, vector<8x128xf32>
      tpu.vector_store %arg4[%c0_9, %c0_10], %13 {strides = array<i32>} : memref<8x128xf32, #tpu.memory_space<vmem>>, vector<8x128xf32>,
    } else {
    }
    %c0 = arith.constant 0 : index
    %c0_1 = arith.constant 0 : index
    %3 = vector.load %arg4[%c0, %c0_1] : memref<8x128xf32, #tpu.memory_space<vmem>>, vector<8x128xf32>
    %c0_2 = arith.constant 0 : index
    %c0_3 = arith.constant 0 : index
    %c0_4 = arith.constant 0 : index
    %4 = vector.load %arg3[%c0_2, %c0_3, %c0_4] : memref<1x128x128xf32, #tpu.memory_space<vmem>>, vector<1x128x128xf32>
    %5 = vector.shape_cast %4 : vector<1x128x128xf32> to vector<128x128xf32>
    %cst = arith.constant dense<0.000000e+00> : vector<8x128xf32>
    %6 = tpu.matmul %3, %5, %cst {dimension_numbers = #tpu.dot_dimension_numbers<[1], [0], [0], [1], [0, 0, 1, 1], [], []>} : vector<8x128xf32>, vector<128x128xf32>, vector<8x128xf32> -> vector<8x128xf32>
    %c1_i32 = arith.constant 1 : i32
    %7 = arith.cmpi eq, %arg1, %c1_i32 : i32
    %true = arith.constant true
    %8 = arith.xori %7, %true : i1
    %9 = arith.extui %8 : i1 to i32
    %c0_i32_5 = arith.constant 0 : i32
    %10 = arith.cmpi ne, %9, %c0_i32_5 : i32
    scf.if %10 {
      %cst_7 = arith.constant 0.000000e+00 : f32
      %13 = vector.broadcast %cst_7 : f32 to vector<8x128xf32>
      %14 = arith.maximumf %6, %13 : vector<8x128xf32>
      %c0_8 = arith.constant 0 : index
      %c0_9 = arith.constant 0 : index
      %15 = vector.load %arg4[%c0_8, %c0_9] : memref<8x128xf32, #tpu.memory_space<vmem>>, vector<8x128xf32>
      tpu.vector_store %arg4[%c0_8, %c0_9], %14 {strides = array<i32>} : memref<8x128xf32, #tpu.memory_space<vmem>>, vector<8x128xf32>,
    } else {
    }
    %11 = arith.extui %7 : i1 to i32
    %c0_i32_6 = arith.constant 0 : i32
    %12 = arith.cmpi ne, %11, %c0_i32_6 : i32
    scf.if %12 {
      %c0_7 = arith.constant 0 : index
      %c0_8 = arith.constant 0 : index
      %13 = vector.load %arg4[%c0_7, %c0_8] : memref<8x128xf32, #tpu.memory_space<vmem>>, vector<8x128xf32>
      tpu.vector_store %arg4[%c0_7, %c0_8], %6 {strides = array<i32>} : memref<8x128xf32, #tpu.memory_space<vmem>>, vector<8x128xf32>,
    } else {
    }
    return
  }
  func.func @transform_0(%arg0: i32, %arg1: i32) -> (i32, i32) {
    %c0_i32 = arith.constant 0 : i32
    %c0_i32_0 = arith.constant 0 : i32
    return %arg0, %c0_i32 : i32, i32
  }
  func.func @transform_1(%arg0: i32, %arg1: i32) -> (i32, i32, i32) {
    %c0_i32 = arith.constant 0 : i32
    %c0_i32_0 = arith.constant 0 : i32
    %c0_i32_1 = arith.constant 0 : i32
    return %arg1, %c0_i32, %c0_i32_0 : i32, i32, i32
  }
  func.func @transform_2(%arg0: i32, %arg1: i32) -> (i32, i32) {
    %c0_i32 = arith.constant 0 : i32
    %c0_i32_0 = arith.constant 0 : i32
    return %arg0, %c0_i32 : i32, i32
  }
}

</mosaic_0001>

<bundles_post_ra>
// kernel: _forward.1
= control target key start
LH: loop header
LB: loop body
LE: loop exit
PB: predicated region body
PF: predicated region fallthrough
CT: control target
= control target key end

     0   :  { %7 = vsyncpa [#allocation3], 0  ;;  %s930_s0 = inlined_call_operand.hbm [shape: f32[8,128], index: 0, kind: input, shape index: {}]   ;;  %s931_s1 = inlined_call_operand.hbm [shape: f32[2,128,128], index: 1, kind: input, shape index: {}]   ;;  %s932_s2 = inlined_call_operand.hbm [shape: f32[8,128], index: 2, kind: output, shape index: {}]  }
   0x1   :  { %8 = vsyncpa [#allocation6], 0 }
   0x2   :  { %10 = vsyncpa [#allocation6 + $0x1], 0 }
   0x3   :  { %11 = vsyncpa [#allocation4], 0  ;;  %s714_s9 = smov 0   ;;  %s716_s10 = smov 0  }
   0x4   :  { %s718_s11 = smov 0   ;;  %s720_s12 = smov 0  }
   0x5   :  { %s722_s13 = smov 0   ;;  %s724_s14 = smov 0  }
   0x6 LB: > { %s375_s15 = sadd.s32 4294967295, %s689_s14   ;;  %s62_s16 = sadd.s32 1, %s677_s11  ;;  %s689_s14 = sphi %s724_s14, %s17_s14   ;;  %s685_s13 = sphi %s722_s13, %s953_s13   ;;  %s681_s12 = sphi %s720_s12, %s952_s12   ;;  %s677_s11 = sphi %s718_s11, %s951_s11   ;;  %s673_s10 = sphi %s716_s10, %s950_s10   ;;  %s669_s9 = sphi %s714_s9, %s949_s9  }
   0x7   : > { %p69_p0 = scmp.ne.s32.totalorder %s677_s11, %s673_s10  ;;  %p70_p1 = scmp.eq.s32.totalorder %s689_s14, 0 }
   0x8   : > { %p75_p2 = scmp.ne.s32.totalorder %s673_s10, %s669_s9  ;;  %p750_p3 = scmp.eq.s32.totalorder %s375_s15, 0 }
   0x9   : > { %p71_p4 = por %p70_p1, %p69_p0  ;;  %p376_p5 = scmp.ge.s32.totalorder %s689_s14, 1 }
   0xa   : > { %s938_s17 = scalar_select %p750_p3, 1, 0 }
   0xb   : > { %p757_p6 = por %p750_p3, %p75_p2  ;;  %p112_p7 = scmp.lt.s32.totalorder %s689_s14, 3 }
   0xc   : > { %s691_s20 = smov [#allocation2]   ;;  %p488_p10 = scmp.lt.s32.totalorder %s689_s14, 2 }
   0xd   : > { %s939_s18 = scalar_select %p757_p6, 1, 0 }
   0xe   : > { %p762_p8 = pnand %p376_p5, %p112_p7  ;;  %s127_s21 = sshll.u32 %s691_s20, 4  ;;  %s128_s21 = int_to_ptr.vmem [resolvable:$true] %s127_s21 }
   0xf   : > { %s138_s22 = sand.u32 1, %s677_s11   ;;  %p776_p12 = pnand %p488_p10, %p71_p4 }
  0x10   : > { %s940_s19 = scalar_select %p762_p8, 1, 0 }
  0x11   : > { %p479_p9 = pneg %p762_p8  ;;  %s547_s27 = scalar_lea.hbm %s930_s0, 128 }
  0x12   : > { %s942_s24 = scalar_select %p776_p12, 1, 0 }
  0x13   : > { %p772_p11 = pnand %p479_p9, %p750_p3  ;;  %p548_p13 = scmp.ne.s32.totalorder %s930_s0, %s547_s27 }
  0x14   : > { %p554_p5 = scmp.lt.u32.totalorder %s547_s27, %s930_s0 }
  0x15   : > { %p549_p0 = pneg %p772_p11 }
  0x17   : > { %p550_p1 = pnand %p549_p0, %p548_p13 }
  0x19   : > { %p551_p2 = pneg %p550_p1 }
  0x1b   : > { %p556_p4 = pnand %p554_p5, %p551_p2 }
  0x1d   : > { %559 = shalt.err (!%p556_p4)
}
  0x1e   : > { %s560_s4 = scalar_lea.vmem %s128_s21, 128  ;;  %p568_p6 = scmp.lt.s32.totalorder %s128_s21, %s128_s21 }
  0x1f   : > { %p561_p7 = scmp.ne.s32.totalorder %s128_s21, %s560_s4  ;;  %p569_p3 = scmp.lt.s32.totalorder %s560_s4, %s560_s4 }
  0x21   : > { %p563_p9 = pnand %p561_p7, %p549_p0  ;;  %p570_p8 = por %p569_p3, %p568_p6 }
  0x23   : > { %p564_p10 = pneg %p563_p9 }
  0x25   : > { %p571_p12 = pnand %p570_p8, %p564_p10 }
  0x27   : > { %574 = shalt.err (!%p571_p12)
}
  0x28   : > { %482 = dma.hbm_to_vmem [thread:$0]  (!%p772_p11), %s930_s0, 128, %s128_s21, [#allocation3]  }
  0x29   : > { %s26_s7 = sadd.s32 1, %s685_s13  ;;  %s379_s8 = sshll.u32 %s138_s22, 7 }
  0x2a   : > { %p27_p13 = scmp.ge.s32.totalorder %s26_s7, 2  ;;  %s392_s9 = sshll.u32 %s685_s13, 11 }
  0x2b   : > { %s142_s20 = scalar_lea.vmem [#allocation5], %s379_s8  ;;  %s805_s27 = scalar_lea.hbm %s931_s1, %s392_s9 }
  0x2c   : > { %s149_s25 = sshll.u32 %s142_s20, 4  ;;  %s955_s7 = smov (%p27_p13, %s26_s7), 0  ;;  %s807_s25 = int_to_ptr.vmem [resolvable:$true] %s149_s25 }
  0x2d   : > { %s59_s21 = ssub.s32 %s685_s13, %s955_s7  ;;  %s817_s29 = scalar_lea.sflag [#allocation6], %s138_s22 }
  0x2e   : > { %p811_p3 = scmp.eq.s32.totalorder %s59_s21, 0  ;;  %s575_s30 = scalar_lea.hbm %s805_s27, 2048 }
  0x2f   : > { %p576_p6 = scmp.ne.s32.totalorder %s805_s27, %s575_s30  ;;  %p944_p8 = scmp.ne.s32.totalorder %s942_s24, 0 }
  0x30   : > { %s580_s5 = scalar_lea.hbm %s931_s1, 4096  ;;  %p581_p1 = scmp.lt.u32.totalorder %s805_s27, %s931_s1 }
  0x31   : > { %p577_p11 = pneg %p944_p8  ;;  %p582_p2 = scmp.lt.u32.totalorder %s580_s5, %s575_s30 }
  0x32   : > { %p584_p4 = scmp.lt.u32.totalorder %s575_s30, %s805_s27 }
  0x33   : > { %p578_p12 = pnand %p577_p11, %p576_p6  ;;  %p583_p5 = por %p582_p2, %p581_p1 }
  0x35   : > { %p579_p0 = pneg %p578_p12  ;;  %p585_p7 = por %p584_p4, %p583_p5 }
  0x37   : > { %p586_p9 = pnand %p585_p7, %p579_p0 }
  0x39   : > { %589 = shalt.err (!%p586_p9)
}
  0x3a   : > { %s590_s22 = scalar_lea.vmem %s807_s25, 2048  ;;  %s692_s9 = smov [#allocation5]  }
  0x3b   : > { %p591_p10 = scmp.ne.s32.totalorder %s807_s25, %s590_s22  ;;  %s595_s20 = sshll.u32 %s692_s9, 4  ;;  %s596_s20 = int_to_ptr.vmem [resolvable:$false] %s595_s20 }
  0x3c   : > { %s597_s23 = scalar_lea.vmem %s596_s20, 4096  ;;  %p598_p12 = scmp.lt.s32.totalorder %s807_s25, %s596_s20 }
  0x3d   : > { %p593_p13 = pnand %p591_p10, %p577_p11  ;;  %p599_p1 = scmp.lt.s32.totalorder %s597_s23, %s590_s22 }
  0x3f   : > { %p594_p6 = pneg %p593_p13  ;;  %p600_p2 = por %p599_p1, %p598_p12 }
  0x41   : > { %p601_p5 = pnand %p600_p2, %p594_p6 }
  0x43   : > { %604 = shalt.err (!%p601_p5)
}
  0x44   : > { %s693_s26 = smov 128   ;;  %s694_s21 = smov 8  }
  0x45   : > { %486 = dma.hbm_to_vmem [thread:$0]  (!%p944_p8), %s805_s27, 2048, %s807_s25, %s817_s29, %s693_s26, %s693_s26, %s694_s21  }
  0x46   : > { %s850_s30 = scalar_select %p811_p3, %s677_s11, %s62_s16  }
  0x47   : > { %p945_p11 = scmp.ne.s32.totalorder %s940_s19, 0 }
  0x48   : > { %p946_p0 = scmp.ne.s32.totalorder (!%p945_p11), %s938_s17, 0 }
  0x49   : > { %161 = sbr.rel (%p945_p11) target bundleno = 377 (0x179), region = 28 }
  0x50   : > { %656 = dma.done.wait (%p946_p0), [#allocation3], 128  }
  0x51   : > { %658 = vsyncadd (%p946_p0), [#allocation3], 4294967168  ;;  %s167_s3 = sand.u32 1, %s673_s10   ;;  %p947_p8 = scmp.ne.s32.totalorder %s939_s18, 0 }
  0x52   : > { %s384_s4 = sshll.u32 %s167_s3, 7  ;;  %s168_s5 = scalar_lea.sflag [#allocation6], %s167_s3 }
  0x53   : > { %s859_s24 = scalar_lea.vmem [#allocation5], %s384_s4 }
  0x54   : > { %660 = dma.done.wait (%p947_p8), %s168_s5, 2048  }
  0x55   : > { %662 = vsyncadd (%p947_p8), %s168_s5, 4294965248  ;;  %p385_p3 = scmp.ne.s32.totalorder %s681_s12, 0 }
  0x56   : > { %v191_v0 = vld [vmem:[#allocation2] sm:$0xff] (!%p385_p3) }
  0x57   : > { %190 = sbr.rel (%p385_p3) target bundleno = 94 (0x5e), region = 40  ;;  %192 = vst [vmem:[#allocation7] sm:$0xff] (!%p385_p3), %v191_v0 }
  0x5e PF: > { %v194_v1 = vld [vmem:[%s859_s24] sm:$0xff]  ;;  %v195_v2 = vld [vmem:[%s859_s24 + $0x8] sm:$0xff]  ;;  %v196_v3 = vld [vmem:[%s859_s24 + $0x10] sm:$0xff]  ;;  %v695_v4 = vmov 0.0|0.0   ;;  %vm696_vm0 = vmmov 0   ;;  %v697_v7 = vmov 0.0  }
  0x5f   : > { %445 = vmatprep.subr.bf16.mxu0 %v695_v4  ;;  %v446_v5 = vpack.c.bf16 %v195_v2, %v194_v1  ;;  %v197_v6 = vld [vmem:[%s859_s24 + $0x18] sm:$0xff]  ;;  %442 = vmatprep.mubr.msk.f32.mxu0 %vm696_vm0, %v697_v7  ;;  %v198_v9 = vld [vmem:[%s859_s24 + $0x20] sm:$0xff]  ;;  %v199_v10 = vld [vmem:[%s859_s24 + $0x28] sm:$0xff]  ;;  %p386_p4 = scmp.eq.s32.totalorder %s681_s12, 1 }
  0x60   : > { %v449_v8 = vpack.c.bf16 %v197_v6, %v196_v3  ;;  %v452_v11 = vpack.c.bf16 %v199_v10, %v198_v9  ;;  %v200_v12 = vld [vmem:[%s859_s24 + $0x30] sm:$0xff]  ;;  %v201_v13 = vld [vmem:[%s859_s24 + $0x38] sm:$0xff]  ;;  %v202_v15 = vld [vmem:[%s859_s24 + $0x40] sm:$0xff] }
  0x61   : > { %447 = vmatpush3.bf16.msra.mxu0 %v446_v5  ;;  %v455_v14 = vpack.c.bf16 %v201_v13, %v200_v12  ;;  %v203_v16 = vld [vmem:[%s859_s24 + $0x48] sm:$0xff]  ;;  %v204_v18 = vld [vmem:[%s859_s24 + $0x50] sm:$0xff]  ;;  %v205_v19 = vld [vmem:[%s859_s24 + $0x58] sm:$0xff] }
  0x62   : > { %448 = vmatprep.subr.bf16.mxu0 %v695_v4  ;;  %v458_v17 = vpack.c.bf16 %v203_v16, %v202_v15  ;;  %v461_v20 = vpack.c.bf16 %v205_v19, %v204_v18  ;;  %v206_v21 = vld [vmem:[%s859_s24 + $0x60] sm:$0xff]  ;;  %v207_v22 = vld [vmem:[%s859_s24 + $0x68] sm:$0xff]  ;;  %v208_v24 = vld [vmem:[%s859_s24 + $0x70] sm:$0xff] }
  0x63   : > { %v464_v23 = vpack.c.bf16 %v207_v22, %v206_v21  ;;  %v209_v25 = vld [vmem:[%s859_s24 + $0x78] sm:$0xff]  ;;  %v193_v27 = vld [vmem:[#allocation7] sm:$0xff] }
  0x64   : > { %v467_v26 = vpack.c.bf16 %v209_v25, %v208_v24 }
  0x65   : > { %450 = vmatpush3.bf16.msra.mxu0 %v449_v8 }
  0x66   : > { %451 = vmatprep.subr.bf16.mxu0 %v695_v4 }
  0x69   : > { %453 = vmatpush3.bf16.msra.mxu0 %v452_v11 }
  0x6a   : > { %454 = vmatprep.subr.bf16.mxu0 %v695_v4 }
  0x6d   : > { %456 = vmatpush3.bf16.msra.mxu0 %v455_v14 }
  0x6e   : > { %457 = vmatprep.subr.bf16.mxu0 %v695_v4 }
  0x71   : > { %459 = vmatpush3.bf16.msra.mxu0 %v458_v17 }
  0x72   : > { %460 = vmatprep.subr.bf16.mxu0 %v695_v4 }
  0x75   : > { %462 = vmatpush3.bf16.msra.mxu0 %v461_v20 }
  0x76   : > { %463 = vmatprep.subr.bf16.mxu0 %v695_v4 }
  0x79   : > { %465 = vmatpush3.bf16.msra.mxu0 %v464_v23 }
  0x7a   : > { %466 = vmatprep.subr.bf16.mxu0 %v695_v4 }
  0x7d   : > { %468 = vmatpush3.bf16.msra.mxu0 %v467_v26 }
  0x80   : > { %443 = vmatmul.mubr.f32.vlgmr.msra.gmra.mrb[0].mxu0 %v193_v27 }
 0x14e   : > { %284 = sbr.rel (%p386_p4) target bundleno = 343 (0x157), region = 44 }
 0x153   : > { %v276_v28 = vpop.f32.mrb[0].mxu0 }
 0x154   : > { %v444_v29 = vpop.f32.mrb[1].mxu0  ;;  %v285_v30 = vmax.f32 (!%p386_p4), %v276_v28, 0.0 }
 0x156   : > { %286 = vst [vmem:[#allocation7] sm:$0xff] %v285_v30 }
 0x157 PF: > { %p387_p7 = scmp.ne.s32.totalorder %s681_s12, 1 }
 0x158   : > { %290 = vst [vmem:[#allocation7] sm:$0xff] (!%p387_p7), %v276_v28 }
 0x159   : > { %289 = sbr.rel (%p387_p7) target bundleno = 352 (0x160), region = 48 }
 0x160 PF: > { %p886_p9 = scmp.eq.s32.totalorder %s375_s15, 1  ;;  %s698_s17 = smov [#allocation7]  }
 0x161   : > { %s300_s18 = sshll.u32 %s698_s17, 4  ;;  %s301_s18 = int_to_ptr.vmem [resolvable:$true] %s300_s18 }
 0x162   : > { %s605_s19 = scalar_lea.vmem %s301_s18, 128  ;;  %p612_p12 = scmp.lt.s32.totalorder %s301_s18, %s301_s18 }
 0x163   : > { %p606_p10 = scmp.ne.s32.totalorder %s301_s18, %s605_s19  ;;  %p613_p1 = scmp.lt.s32.totalorder %s605_s19, %s605_s19 }
 0x165   : > { %p607_p13 = pnand %p606_p10, %p886_p9  ;;  %p614_p2 = por %p613_p1, %p612_p12 }
 0x167   : > { %p608_p6 = pneg %p607_p13 }
 0x169   : > { %p615_p5 = pnand %p614_p2, %p608_p6 }
 0x16b   : > { %618 = shalt.err (!%p615_p5)
}
 0x16c   : > { %s619_s15 = scalar_lea.hbm %s932_s2, 128 }
 0x16d   : > { %p620_p11 = scmp.ne.s32.totalorder %s932_s2, %s619_s15  ;;  %p625_p3 = scmp.lt.u32.totalorder %s619_s15, %s932_s2 }
 0x16f   : > { %p621_p0 = pnand %p620_p11, %p886_p9 }
 0x171   : > { %p622_p8 = pneg %p621_p0 }
 0x173   : > { %p627_p4 = pnand %p625_p3, %p622_p8 }
 0x175   : > { %630 = shalt.err (!%p627_p4)
}
 0x176   : > { %476 = dma.vmem_to_hbm [thread:$0]  (%p886_p9), %s301_s18, 128, %s932_s2, [#allocation4]  }
 0x177   : > { %664 = dma.done.wait (%p886_p9), [#allocation4], 128  }
 0x178   : > { %666 = vsyncadd (%p886_p9), [#allocation4], 4294967168 }
 0x179 PF: > { %s17_s14 = sadd.s32 1, %s689_s14   ;;  %s949_s9 = smov %s673_s10 }
 0x17a   : > { %p14_p7 = scmp.ge.s32.totalorder %s17_s14, 4   ;;  %s950_s10 = smov %s677_s11 }
 0x17b   : > { %s951_s11 = smov %s850_s30  ;;  %s952_s12 = smov %s685_s13 }
 0x17c   : > { %s953_s13 = smov %s955_s7  ;;  %16 = sbr.rel (!%p14_p7) target bundleno = 6 (0x6), region = 84 }
 0x183   :  { %313 = vsyncpa [#allocation3], 1 }
 0x184   :  { %315 = vsyncpa [#allocation3 + $0x1], 1 }
 0x185   :  { %316 = vsyncpa [#allocation6], 1 }
 0x186   :  { %318 = vsyncpa [#allocation6 + $0x1], 1 }
 0x187   :  { %319 = vsyncpa [#allocation4], 1 }
 0x188   :  { %321 = vsyncpa [#allocation4 + $0x1], 1 }

</bundles_post_ra>
